<compile_context>
chip_gen: v5e
topology: v5e:2x2
jax: 0.10.0
libtpu: 0.0.40
codegen_flags: <defaults>
</compile_context>

<pallas_src>
import math

import jax
import jax.numpy as jnp
from jax.experimental import pallas as pl
from jax.experimental.pallas import tpu as pltpu

LANES = 128
_MAX_COLS = 4096                       # widest lane-dense flattening we try
_TARGET_BLOCK_BYTES = 2 * 1024 * 1024  # ~2 MiB blocks: safe on v5e/v6e/v7x


def _copy_kernel(x_ref, o_ref):
    # Pure identity copy of the current (block_rows, cols) tile.
    o_ref[...] = x_ref[...]


def _resolve_size(numel, size):
    """Mimic torch.Tensor.view size resolution, including a single -1."""
    size = tuple(int(s) for s in size)
    if size.count(-1) > 1:
        raise ValueError("only one dimension can be inferred")
    if -1 in size:
        known = 1
        for s in size:
            if s != -1:
                known *= s
        if known == 0 or numel % known != 0:
            raise ValueError(f"shape {size} is invalid for input of size {numel}")
        size = tuple(numel // known if s == -1 else s for s in size)
    if math.prod(size) != numel:
        raise ValueError(f"shape {size} is invalid for input of size {numel}")
    return size


def _choose_cols(numel):
    """Largest multiple of 128 that divides numel (capped at _MAX_COLS); 0 if none."""
    best = 0
    c = LANES
    while c <= min(numel, _MAX_COLS):
        if numel % c == 0:
            best = c
        c += LANES
    return best


def _choose_block_rows(rows, cols, itemsize):
    """Dtype-aware sublane blocking: multiple of 32 (covers f32/bf16/int8 packing)
    targeting ~_TARGET_BLOCK_BYTES per block, or the full row extent if small."""
    if rows <= 32:
        return rows  # block equals full second-to-last dim: always legal
    br = (_TARGET_BLOCK_BYTES // (cols * itemsize)) // 32 * 32
    br = max(32, br)
    return min(br, rows)


def _pallas_copy_2d(flat2d, block_rows, cols):
    rows = flat2d.shape[0]
    grid = (pl.cdiv(rows, block_rows),)
    return pl.pallas_call(
        _copy_kernel,
        out_shape=jax.ShapeDtypeStruct((rows, cols), flat2d.dtype),
        grid_spec=pltpu.PrefetchScalarGridSpec(
            num_scalar_prefetch=0,
            grid=grid,
            in_specs=[pl.BlockSpec((block_rows, cols), lambda i: (i, 0))],
            out_specs=pl.BlockSpec((block_rows, cols), lambda i: (i, 0)),
        ),
        compiler_params=pltpu.CompilerParams(
            dimension_semantics=("parallel",),
            vmem_limit_bytes=32 * 1024 * 1024,
        ),
        # Identity copy: let XLA write in place / drop the extra HBM buffer.
        input_output_aliases={0: 0},
    )(flat2d)


def view_pallas(x, size):
    """Equivalent of torch.Tensor.view(size); data movement done in Pallas."""
    numel = x.size
    out_shape = _resolve_size(numel, size)

    # View is metadata-only; zero-size inputs never need a kernel launch.
    if numel == 0:
        return jnp.reshape(x, out_shape)

    itemsize = jnp.dtype(x.dtype).itemsize
    flat = jnp.reshape(x, (-1,))  # row-major, matches PyTorch contiguous layout

    cols = _choose_cols(numel)
    if cols > 0:
        # Common, no-padding path: lane-dense flattening, no extra HBM passes.
        rows = numel // cols
        flat2d = jnp.reshape(flat, (rows, cols))
        block_rows = _choose_block_rows(rows, cols, itemsize)
        copied = _pallas_copy_2d(flat2d, block_rows, cols)
        return jnp.reshape(copied, out_shape)

    # Rare fallback (numel not a multiple of 128): pad to a lane-dense tile,
    # copy, strip the padding.  Costs one extra HBM pass on tiny/odd tensors.
    # TODO(synk): handle the ragged tail with an in-kernel masked store instead.
    cols = min(2048, pl.cdiv(numel, LANES) * LANES)
    rows = pl.cdiv(numel, cols)
    padded = rows * cols
    flat = jnp.pad(flat, (0, padded - numel))
    flat2d = jnp.reshape(flat, (rows, cols))
    block_rows = _choose_block_rows(rows, cols, itemsize)
    copied = _pallas_copy_2d(flat2d, block_rows, cols)
    return jnp.reshape(jnp.reshape(copied, (-1,))[:numel], out_shape)


if __name__ == "__main__":
    key = jax.random.PRNGKey(0)

    # NCHW-style input, as a nn.Sequential would feed into View(...).
    x = jax.random.normal(key, (2, 4, 16, 16), dtype=jnp.float32)

    # View((-1, 4*16*16)): flatten per-sample features before a Linear layer.
    size = (-1, 4 * 16 * 16)
    y = jax.block_until_ready(jax.jit(lambda t: view_pallas(t, size))(x))
    ref = jnp.reshape(x, (2, 4 * 16 * 16))
    assert y.shape == ref.shape and y.dtype == ref.dtype
    assert bool(jnp.all(y == ref))

    # bf16 input: exercises the dtype-aware (multiple-of-32 sublane) blocking.
    xb = x.astype(jnp.bfloat16)
    yb = jax.block_until_ready(jax.jit(lambda t: view_pallas(t, (2, 4, 256)))(xb))
    refb = jnp.reshape(xb, (2, 4, 256))
    assert yb.shape == refb.shape and yb.dtype == refb.dtype
    assert bool(jnp.all(yb == refb))

    # Odd element count (numel % 128 != 0): exercises the padded fallback.
    xr = jax.random.normal(key, (3, 5, 7), dtype=jnp.float32)
    yr = jax.block_until_ready(jax.jit(lambda t: view_pallas(t, (-1,)))(xr))
    assert bool(jnp.all(yr == jnp.reshape(xr, (-1,))))

    print("KERNEL_OK")
</pallas_src>

<mosaic_0001>
module attributes {stable_mosaic.version = 11 : i64} {
  func.func @_copy_kernel(%arg0: i32, %arg1: memref<1x2048xf32, #tpu.memory_space<vmem>>, %arg2: memref<1x2048xf32, #tpu.memory_space<vmem>>) attributes {dimension_semantics = [#tpu.dimension_semantics<parallel>], iteration_bounds = array<i64: 1>, scalar_prefetch = 0 : i64, scratch_operands = 0 : i64, tpu.core_type = #tpu.core_type<tc>, window_params = [{transform_indices = @transform_0, window_bounds = array<i64: 1, 2048>}, {transform_indices = @transform_1, window_bounds = array<i64: 1, 2048>}]} {
    %c0 = arith.constant 0 : index
    %c0_0 = arith.constant 0 : index
    %0 = vector.load %arg1[%c0, %c0_0] : memref<1x2048xf32, #tpu.memory_space<vmem>>, vector<1x2048xf32>
    %c0_1 = arith.constant 0 : index
    %c0_2 = arith.constant 0 : index
    %1 = vector.load %arg2[%c0_1, %c0_2] : memref<1x2048xf32, #tpu.memory_space<vmem>>, vector<1x2048xf32>
    tpu.vector_store %arg2[%c0_1, %c0_2], %0 {strides = array<i32>} : memref<1x2048xf32, #tpu.memory_space<vmem>>, vector<1x2048xf32>,
    return
  }
  func.func @transform_0(%arg0: i32) -> (i32, i32) {
    %c0_i32 = arith.constant 0 : i32
    %c0_i32_0 = arith.constant 0 : i32
    return %arg0, %c0_i32 : i32, i32
  }
  func.func @transform_1(%arg0: i32) -> (i32, i32) {
    %c0_i32 = arith.constant 0 : i32
    %c0_i32_0 = arith.constant 0 : i32
    return %arg0, %c0_i32 : i32, i32
  }
}

</mosaic_0001>

<bundles_post_ra>
// kernel: _lambda_.1
= control target key start
LH: loop header
LB: loop body
LE: loop exit
PB: predicated region body
PF: predicated region fallthrough
CT: control target
= control target key end

     0   :  { %s38_s0 = inlined_call_operand.vmem [shape: f32[1,2048], index: 0, kind: input, shape index: {}, may-alias: {0,1}]   ;;  %s39_s1 = inlined_call_operand.vmem [shape: f32[1,2048], index: 1, kind: output, shape index: {}, may-alias: {0,1}]  }
   0x1   :  { %v8_v0 = vld [vmem:[%s38_s0] sm:$0xff]  ;;  %v9_v1 = vld [vmem:[%s38_s0 + $0x8] sm:$0xff] }
   0x2   :  { %10 = vst [vmem:[%s39_s1] sm:$0xff] %v8_v0 }
   0x3   :  { %11 = vst [vmem:[%s39_s1 + $0x8] sm:$0xff] %v9_v1 }

</bundles_post_ra>
